<compile_context>
chip_gen: v7x
topology: tpu7x:2x2x1
jax: 0.10.0
libtpu: 0.0.40
codegen_flags: <defaults>
</compile_context>

<pallas_src>
import jax
import jax.numpy as jnp
from jax.experimental import pallas as pl
from jax.experimental.pallas import tpu as pltpu


def decomposition_kernel(avg_ref, x_ref, seasonal_ref, trend_ref):
    # avg_ref: (T, T) averaging matrix (encodes replicate-pad + mean window).
    # x_ref / seasonal_ref / trend_ref: (T, D) -- one batch element (squeezed).
    x = x_ref[...]                                            # (T, D)
    trend = jnp.dot(avg_ref[...], x,                          # single MXU matmul
                    preferred_element_type=jnp.float32)
    trend_ref[...] = trend.astype(trend_ref.dtype)
    seasonal_ref[...] = (x - trend.astype(x.dtype))           # x - x_trend


def _build_avg_matrix(T, kernel_size):
    """(T, T) matrix M with (M @ x)[t] == mean_k x[clip(t + k - p, 0, T-1)]."""
    p = (kernel_size - 1) // 2
    src = jnp.clip(jnp.arange(T)[:, None] + jnp.arange(kernel_size)[None, :] - p,
                   0, T - 1)                                   # (T, K)
    return jax.nn.one_hot(src, T, dtype=jnp.float32).sum(axis=1) / kernel_size


def decomposition_forward(x, kernel_size):
    """x: (B, T, D) float32 -> (seasonal, trend), both (B, T, D)."""
    B, T, D = x.shape
    p = (kernel_size - 1) // 2
    # PyTorch semantics: pooled length T + 2p - K + 1 must equal T (odd K),
    # otherwise `x - x_trend` would not broadcast in the original module.
    assert 2 * p - kernel_size + 1 == 0, "kernel_size must be odd"
    avg_mat = _build_avg_matrix(T, kernel_size)

    seasonal, trend = pl.pallas_call(
        decomposition_kernel,
        out_shape=(jax.ShapeDtypeStruct((B, T, D), x.dtype),
                   jax.ShapeDtypeStruct((B, T, D), x.dtype)),
        grid=(B,),
        in_specs=[pl.BlockSpec((T, T), lambda b: (0, 0)),      # A stays resident
                  pl.BlockSpec((None, T, D), lambda b: (b, 0, 0))],
        out_specs=(pl.BlockSpec((None, T, D), lambda b: (b, 0, 0)),
                   pl.BlockSpec((None, T, D), lambda b: (b, 0, 0))),
        compiler_params=pltpu.CompilerParams(
            dimension_semantics=("parallel",)),                # v7x: 2 TCs share B
    )(avg_mat, x)
    return seasonal, trend


def reference_forward(x, kernel_size):
    """Plain-JAX replica of the PyTorch DecompositionLayer.forward."""
    p = (kernel_size - 1) // 2
    front = jnp.repeat(x[:, :1, :], p, axis=1)                 # x[:,0:1,:].repeat
    end = jnp.repeat(x[:, -1:, :], p, axis=1)                  # x[:,-1:,:].repeat
    xp = jnp.concatenate([front, x, end], axis=1)              # (B, T+2p, D)
    T = x.shape[1]
    trend = jnp.stack([xp[:, t:t + kernel_size, :].mean(axis=1)
                       for t in range(T)], axis=1)             # AvgPool1d stride 1
    return x - trend, trend


if __name__ == "__main__":
    # Small shapes consistent with the module: Batch x Time x EMBED_DIM.
    B, T, D = 2, 16, 32
    kernel_size = 5

    x = jax.random.normal(jax.random.PRNGKey(0), (B, T, D), jnp.float32)

    seasonal, trend = decomposition_forward(x, kernel_size)
    seasonal, trend = jax.block_until_ready((seasonal, trend))

    seasonal_ref, trend_ref = reference_forward(x, kernel_size)
    assert seasonal.shape == (B, T, D) and trend.shape == (B, T, D)
    assert jnp.allclose(trend, trend_ref, atol=1e-5, rtol=1e-5)
    assert jnp.allclose(seasonal, seasonal_ref, atol=1e-5, rtol=1e-5)
    print("KERNEL_OK")
</pallas_src>

<mosaic_0001>
module attributes {stable_mosaic.version = 11 : i64} {
  func.func @decomposition_kernel(%arg0: i32, %arg1: memref<16x16xf32, #tpu.memory_space<vmem>>, %arg2: memref<1x16x32xf32, #tpu.memory_space<vmem>>, %arg3: memref<1x16x32xf32, #tpu.memory_space<vmem>>, %arg4: memref<1x16x32xf32, #tpu.memory_space<vmem>>) attributes {dimension_semantics = [#tpu.dimension_semantics<parallel>], iteration_bounds = array<i64: 2>, scalar_prefetch = 0 : i64, scratch_operands = 0 : i64, tpu.core_type = #tpu.core_type<tc>, window_params = [{pipeline_mode = #tpu.pipeline_mode<synchronous>, transform_indices = @transform_0, window_bounds = array<i64: 16, 16>}, {transform_indices = @transform_1, window_bounds = array<i64: 1, 16, 32>}, {transform_indices = @transform_2, window_bounds = array<i64: 1, 16, 32>}, {transform_indices = @transform_3, window_bounds = array<i64: 1, 16, 32>}]} {
    %c0 = arith.constant 0 : index
    %c0_0 = arith.constant 0 : index
    %c0_1 = arith.constant 0 : index
    %0 = vector.load %arg2[%c0, %c0_0, %c0_1] : memref<1x16x32xf32, #tpu.memory_space<vmem>>, vector<1x16x32xf32>
    %1 = vector.shape_cast %0 : vector<1x16x32xf32> to vector<16x32xf32>
    %c0_2 = arith.constant 0 : index
    %c0_3 = arith.constant 0 : index
    %2 = vector.load %arg1[%c0_2, %c0_3] : memref<16x16xf32, #tpu.memory_space<vmem>>, vector<16x16xf32>
    %cst = arith.constant dense<0.000000e+00> : vector<16x32xf32>
    %3 = tpu.matmul %2, %1, %cst {dimension_numbers = #tpu.dot_dimension_numbers<[1], [0], [0], [1], [0, 0, 1, 1], [], []>} : vector<16x16xf32>, vector<16x32xf32>, vector<16x32xf32> -> vector<16x32xf32>
    %c0_4 = arith.constant 0 : index
    %c0_5 = arith.constant 0 : index
    %c0_6 = arith.constant 0 : index
    %4 = vector.load %arg4[%c0_4, %c0_5, %c0_6] : memref<1x16x32xf32, #tpu.memory_space<vmem>>, vector<1x16x32xf32>
    %5 = vector.shape_cast %4 : vector<1x16x32xf32> to vector<16x32xf32>
    %6 = vector.shape_cast %3 : vector<16x32xf32> to vector<1x16x32xf32>
    tpu.vector_store %arg4[%c0_4, %c0_5, %c0_6], %6 {strides = array<i32>} : memref<1x16x32xf32, #tpu.memory_space<vmem>>, vector<1x16x32xf32>,
    %7 = arith.subf %1, %3 : vector<16x32xf32>
    %c0_7 = arith.constant 0 : index
    %c0_8 = arith.constant 0 : index
    %c0_9 = arith.constant 0 : index
    %8 = vector.load %arg3[%c0_7, %c0_8, %c0_9] : memref<1x16x32xf32, #tpu.memory_space<vmem>>, vector<1x16x32xf32>
    %9 = vector.shape_cast %8 : vector<1x16x32xf32> to vector<16x32xf32>
    %10 = vector.shape_cast %7 : vector<16x32xf32> to vector<1x16x32xf32>
    tpu.vector_store %arg3[%c0_7, %c0_8, %c0_9], %10 {strides = array<i32>} : memref<1x16x32xf32, #tpu.memory_space<vmem>>, vector<1x16x32xf32>,
    return
  }
  func.func @transform_0(%arg0: i32) -> (i32, i32) {
    %c0_i32 = arith.constant 0 : i32
    %c0_i32_0 = arith.constant 0 : i32
    %c0_i32_1 = arith.constant 0 : i32
    return %c0_i32, %c0_i32_0 : i32, i32
  }
  func.func @transform_1(%arg0: i32) -> (i32, i32, i32) {
    %c0_i32 = arith.constant 0 : i32
    %c0_i32_0 = arith.constant 0 : i32
    %c0_i32_1 = arith.constant 0 : i32
    return %arg0, %c0_i32, %c0_i32_0 : i32, i32, i32
  }
  func.func @transform_2(%arg0: i32) -> (i32, i32, i32) {
    %c0_i32 = arith.constant 0 : i32
    %c0_i32_0 = arith.constant 0 : i32
    %c0_i32_1 = arith.constant 0 : i32
    return %arg0, %c0_i32, %c0_i32_0 : i32, i32, i32
  }
  func.func @transform_3(%arg0: i32) -> (i32, i32, i32) {
    %c0_i32 = arith.constant 0 : i32
    %c0_i32_0 = arith.constant 0 : i32
    %c0_i32_1 = arith.constant 0 : i32
    return %arg0, %c0_i32, %c0_i32_0 : i32, i32, i32
  }
}

</mosaic_0001>

<bundles_post_ra>
// kernel: tpu_custom_call.1
= control target key start
LH: loop header
LB: loop body
LE: loop exit
PB: predicated region body
PF: predicated region fallthrough
CT: control target
= control target key end

     0   :  { %9 = vsyncpa [#allocation3], 0  ;;  %s1009_s0 = inlined_call_operand.hbm [shape: f32[16,16], index: 0, kind: input, shape index: {}]   ;;  %s1010_s1 = inlined_call_operand.hbm [shape: f32[2,16,32], index: 1, kind: input, shape index: {}]   ;;  %s1011_s2 = inlined_call_operand.hbm [shape: f32[2,16,32], index: 2, kind: output, shape index: {0}]   ;;  %s1012_s3 = inlined_call_operand.hbm [shape: f32[2,16,32], index: 3, kind: output, shape index: {1}]  }
   0x1   :  { %10 = vsyncpa [#allocation6], 0 }
   0x2   :  { %12 = vsyncpa [#allocation6 + $0x1], 0 }
   0x3   :  { %13 = vsyncpa [#allocation4], 0 }
   0x4   :  { %15 = vsyncpa [#allocation4 + $0x1], 0 }
   0x5   :  { %16 = vsyncpa [#allocation9], 0 }
   0x6   :  { %18 = vsyncpa [#allocation9 + $0x1], 0  ;;  %s756_s12 = smov 0   ;;  %s758_s13 = smov 0  }
   0x7   :  { %s760_s14 = smov 0   ;;  %s762_s15 = smov 0  }
   0x8 LB: > { %s777_s16 = sadd.s32 4294967295, %s726_s15   ;;  %s460_s17 = sadd.s32 4294967294, %s726_s15   ;;  %s726_s15 = sphi %s762_s15, %s1032_s15   ;;  %s722_s14 = sphi %s760_s14, %s1031_s14   ;;  %s718_s13 = sphi %s758_s13, %s1030_s13   ;;  %s714_s12 = sphi %s756_s12, %s1029_s12  }
   0x9   : > { %p65_p0 = scmp.ne.s32.totalorder %s718_s13, %s714_s12  ;;  %p1013_p1 = scmp.eq.s32.totalorder %s777_s16, 0 }
   0xa   : > { %p95_p3 = scmp.eq.s32.totalorder %s460_s17, 1  ;;  %p461_p5 = scmp.ge.s32.totalorder %s726_s15, 1 }
   0xb   : > { %p786_p4 = por %p1013_p1, %p65_p0  ;;  %p128_p7 = scmp.lt.s32.totalorder %s726_s15, 3 }
   0xc   : > { %p791_p6 = por %p95_p3, %p65_p0  ;;  %s728_s21 = smov [#allocation2]  }
   0xd   : > { %s1016_s18 = scalar_select %p786_p4, 1, 0 }
   0xe   : > { %s1017_s19 = scalar_select %p791_p6, 1, 0 }
   0xf   : > { %p796_p8 = pnand %p461_p5, %p128_p7  ;;  %s140_s22 = sshll.u32 %s728_s21, 4  ;;  %s800_s22 = int_to_ptr.vmem [resolvable:$true] %s140_s22 }
  0x10   : > { %s812_s24 = sadd.s32 1, %s726_s15   ;;  %s52_s25 = sadd.s32 1, %s722_s14 }
  0x11   : > { %s1018_s20 = scalar_select %p796_p8, 1, 0 }
  0x12   : > { %p510_p9 = pneg %p796_p8  ;;  %s49_s26 = ssub.s32 %s726_s15, %s812_s24 }
  0x13   : > { %s566_s29 = scalar_lea.hbm %s1009_s0, 256 }
  0x14   : > { %p807_p11 = pnand %p510_p9, %p1013_p1  ;;  %p567_p12 = scmp.ne.s32.totalorder %s1009_s0, %s566_s29 }
  0x15   : > { %p573_p5 = scmp.lt.u32.totalorder %s566_s29, %s1009_s0 }
  0x16   : > { %p568_p13 = pneg %p807_p11 }
  0x18   : > { %p569_p0 = pnand %p568_p13, %p567_p12 }
  0x1a   : > { %p570_p3 = pneg %p569_p0 }
  0x1c   : > { %p575_p7 = pnand %p573_p5, %p570_p3 }
  0x1e   : > { %578 = shalt.err (!%p575_p7)
}
  0x1f   : > { %s579_s7 = scalar_lea.vmem %s800_s22, 256  ;;  %p587_p2 = scmp.lt.s32.totalorder %s800_s22, %s800_s22 }
  0x20   : > { %p580_p9 = scmp.ne.s32.totalorder %s800_s22, %s579_s7  ;;  %p588_p6 = scmp.lt.s32.totalorder %s579_s7, %s579_s7 }
  0x22   : > { %p582_p10 = pnand %p580_p9, %p568_p13  ;;  %p589_p4 = por %p588_p6, %p587_p2 }
  0x24   : > { %p583_p1 = pneg %p582_p10 }
  0x26   : > { %p590_p8 = pnand %p589_p4, %p583_p1 }
  0x28   : > { %593 = shalt.err (!%p590_p8)
}
  0x29   : > { %s729_s8 = smov 128   ;;  %s730_s9 = smov 8  }
  0x2a   : > { %513 = dma.hbm_to_vmem [thread:$0]  (!%p807_p11), %s1009_s0, 256, %s800_s22, [#allocation3], %s729_s8, %s729_s8, %s730_s9  }
  0x2b   : > { %p50_p1 = scmp.eq.s32.totalorder %s49_s26, 0  ;;  %p59_p2 = scmp.ne.s32.totalorder %s722_s14, %s718_s13 }
  0x2c   : > { %p60_p4 = scmp.eq.s32.totalorder %s726_s15, 0  ;;  %p526_p6 = scmp.lt.s32.totalorder %s726_s15, 2 }
  0x2d   : > { %s846_s17 = scalar_select %p50_p1, %s722_s14, %s52_s25  }
  0x2e   : > { %p61_p8 = por %p60_p4, %p59_p2  ;;  %p1020_p10 = scmp.eq.s32.totalorder %s777_s16, 1 }
  0x2f   : > { %s154_s23 = sand.u32 1, %s722_s14   ;;  %s482_s27 = sshll.u32 %s726_s15, 8 }
  0x30   : > { %p850_p12 = por %p1020_p10, %p59_p2  ;;  %s464_s28 = sshll.u32 %s154_s23, 4 }
  0x31   : > { %s859_s4 = scalar_lea.hbm %s1010_s1, %s482_s27  ;;  %s158_s22 = scalar_lea.vmem [#allocation5], %s464_s28 }
  0x32   : > { %s165_s25 = sshll.u32 %s158_s22, 4  ;;  %p861_p11 = pnand %p526_p6, %p61_p8  ;;  %s865_s25 = int_to_ptr.vmem [resolvable:$true] %s165_s25 }
  0x33   : > { %s867_s5 = scalar_lea.sflag [#allocation6], %s154_s23  ;;  %s594_s6 = scalar_lea.hbm %s859_s4, 256 }
  0x34   : > { %p595_p13 = scmp.ne.s32.totalorder %s859_s4, %s594_s6  ;;  %p596_p0 = pneg %p861_p11 }
  0x35   : > { %s599_s11 = scalar_lea.hbm %s1010_s1, 512  ;;  %p600_p7 = scmp.lt.u32.totalorder %s859_s4, %s1010_s1 }
  0x36   : > { %p597_p3 = pnand %p596_p0, %p595_p13  ;;  %p601_p9 = scmp.lt.u32.totalorder %s599_s11, %s594_s6 }
  0x37   : > { %p603_p2 = scmp.lt.u32.totalorder %s594_s6, %s859_s4 }
  0x38   : > { %p598_p5 = pneg %p597_p3  ;;  %p602_p1 = por %p601_p9, %p600_p7 }
  0x3a   : > { %p604_p4 = por %p603_p2, %p602_p1 }
  0x3c   : > { %p605_p6 = pnand %p604_p4, %p598_p5 }
  0x3e   : > { %608 = shalt.err (!%p605_p6)
}
  0x3f   : > { %s609_s23 = scalar_lea.vmem %s865_s25, 256  ;;  %s731_s29 = smov [#allocation5]  }
  0x40   : > { %p610_p8 = scmp.ne.s32.totalorder %s865_s25, %s609_s23  ;;  %s614_s30 = sshll.u32 %s731_s29, 4  ;;  %s615_s30 = int_to_ptr.vmem [resolvable:$false] %s614_s30 }
  0x41   : > { %s616_s22 = scalar_lea.vmem %s615_s30, 512  ;;  %p617_p3 = scmp.lt.s32.totalorder %s865_s25, %s615_s30 }
  0x42   : > { %p612_p10 = pnand %p610_p8, %p596_p0  ;;  %p618_p7 = scmp.lt.s32.totalorder %s616_s22, %s609_s23 }
  0x44   : > { %p613_p13 = pneg %p612_p10  ;;  %p619_p9 = por %p618_p7, %p617_p3 }
  0x46   : > { %p620_p1 = pnand %p619_p9, %p613_p13 }
  0x48   : > { %623 = shalt.err (!%p620_p1)
}
  0x49   : > { %517 = dma.hbm_to_vmem [thread:$0]  (!%p861_p11), %s859_s4, 256, %s865_s25, %s867_s5, %s729_s8, %s729_s8, %s730_s9  }
  0x4a   : > { %p1023_p0 = scmp.ne.s32.totalorder %s1018_s20, 0 }
  0x4b   : > { %p1024_p5 = scmp.eq.s32.totalorder (!%p1023_p0), %s777_s16, 0 }
  0x4c   : > { %177 = sbr.rel (%p1023_p0) target bundleno = 347 (0x15b), region = 28 }
  0x53   : > { %697 = dma.done.wait (%p1024_p5), [#allocation3], 256   ;;  %p1025_p2 = pmov %p1024_p5 }
  0x54   : > { %s905_s6 = sand.u32 1, %s718_s13   ;;  %p1026_p4 = scmp.ne.s32.totalorder %s1016_s18, 0 }
  0x55   : > { %699 = vsyncadd (%p1025_p2), [#allocation3], 4294967040  ;;  %s469_s26 = sshll.u32 %s905_s6, 4  ;;  %s184_s7 = scalar_lea.sflag [#allocation6], %s905_s6 }
  0x56   : > { %s187_s10 = scalar_lea.vmem [#allocation5], %s469_s26 }
  0x57   : > { %701 = dma.done.wait (%p1026_p4), %s184_s7, 256  }
  0x58   : > { %703 = vsyncadd (%p1026_p4), %s184_s7, 4294967040  ;;  %vm219_vm0 = vcmask 130048   ;;  %v215_v0 = vld [vmem:[%s187_s10] sm:$0xff]  ;;  %v216_v1 = vld [vmem:[%s187_s10 + $0x8] sm:$0xff]  ;;  %s214_s20 = scalar_lea.vmem [#allocation8], %s469_s26  ;;  %s483_s9 = sshll.u32 %s777_s16, 8 }
  0x59   : > { %v217_v2 = vld [vmem:[#allocation2] sm:$0xff]  ;;  %v496_v3 = vpack.c.bf16 %v216_v1, %v215_v0  ;;  %v218_v4 = vld [vmem:[#allocation2 + $0x8] sm:$0xff]  ;;  %s343_s8 = sshll.u32 %s214_s20, 4  ;;  %vm301_vm1 = vcmask 261120   ;;  %s916_s18 = scalar_lea.vmem [#allocation7], %s469_s26  ;;  %s914_s8 = int_to_ptr.vmem [resolvable:$true] %s343_s8 }
  0x5a   : > { %493 = vmatprep.mubr.msk.f32.mxu0 %vm219_vm0, %v217_v2  ;;  %s327_s4 = sshll.u32 %s916_s18, 4  ;;  %s922_s11 = scalar_lea.hbm %s1012_s3, %s483_s9  ;;  %s931_s4 = int_to_ptr.vmem [resolvable:$true] %s327_s4 }
  0x5b   : > { %497 = vmatprep.subr.bf16.mxu0 %v496_v3  ;;  %s929_s28 = scalar_lea.hbm %s1011_s2, %s483_s9  ;;  %s314_s23 = scalar_lea.sflag [#allocation9], %s905_s6 }
  0x5c   : > { %499 = vmatpush3.bf16.msra.mxu0 %v496_v3  ;;  %s624_s29 = scalar_lea.vmem %s914_s8, 256  ;;  %s732_s30 = smov [#allocation8]  }
  0x5d   : > { %p625_p11 = scmp.ne.s32.totalorder %s914_s8, %s624_s29  ;;  %s628_s22 = sshll.u32 %s732_s30, 4  ;;  %s629_s22 = int_to_ptr.vmem [resolvable:$false] %s628_s22 }
  0x5e   : > { %s630_s26 = scalar_lea.vmem %s629_s22, 512  ;;  %p631_p10 = scmp.lt.s32.totalorder %s914_s8, %s629_s22 }
  0x5f   : > { %494 = vmatmul.mubr.msk.f32.vlgmr.msra.gmra.mrb[0].mxu0 %vm219_vm0, %v218_v4  ;;  %p626_p6 = pnand %p625_p11, %p850_p12  ;;  %p632_p13 = scmp.lt.s32.totalorder %s630_s26, %s624_s29 }
  0x61   : > { %p627_p8 = pneg %p626_p6  ;;  %p633_p3 = por %p632_p13, %p631_p10 }
  0x63   : > { %p634_p7 = pnand %p633_p3, %p627_p8 }
 0x132   : > { %v495_v5 = vpop.f32.mrb[0].mxu0 }
 0x133   : > { %303 = vst.msk [vmem:[%s214_s20 + $0x8] sm:$0xff] %vm301_vm1, %v495_v5  ;;  %v305_v6 = vsub.f32 %v216_v1, %v495_v5  ;;  %v292_v7 = vpop.f32.mrb[1].mxu0 }
 0x134   : > { %302 = vst.msk [vmem:[%s214_s20] sm:$0xff] %vm301_vm1, %v292_v7  ;;  %v304_v8 = vsub.f32 %v215_v0, %v292_v7 }
 0x135   : > { %307 = vst.msk [vmem:[%s916_s18 + $0x8] sm:$0xff] %vm301_vm1, %v305_v6 }
 0x136   : > { %637 = shalt.err (!%p634_p7)
}
 0x137   : > { %s638_s7 = scalar_lea.hbm %s922_s11, 256  ;;  %s642_s9 = scalar_lea.hbm %s1012_s3, 512 }
 0x138   : > { %p639_p9 = scmp.ne.s32.totalorder %s922_s11, %s638_s7  ;;  %p643_p5 = scmp.lt.u32.totalorder %s922_s11, %s1012_s3 }
 0x139   : > { %p644_p2 = scmp.lt.u32.totalorder %s642_s9, %s638_s7  ;;  %p646_p11 = scmp.lt.u32.totalorder %s638_s7, %s922_s11 }
 0x13a   : > { %p640_p1 = pnand %p639_p9, %p850_p12 }
 0x13b   : > { %p645_p4 = por %p644_p2, %p643_p5 }
 0x13c   : > { %p641_p0 = pneg %p640_p1 }
 0x13d   : > { %p647_p6 = por %p646_p11, %p645_p4 }
 0x13f   : > { %p648_p8 = pnand %p647_p6, %p641_p0 }
 0x141   : > { %651 = shalt.err (!%p648_p8)
}
 0x142   : > { %s733_s16 = smov 128   ;;  %s734_s27 = smov 8   ;;  %306 = vst.msk [vmem:[%s916_s18] sm:$0xff] %vm301_vm1, %v304_v8 }
 0x143   : > { %507 = dma.vmem_to_hbm [thread:$0]  (%p850_p12), %s914_s8, 256, %s922_s11, %s314_s23, %s733_s16, %s733_s16, %s734_s27  }
 0x144   : > { %s309_s29 = scalar_lea.sflag [#allocation4], %s905_s6  ;;  %s652_s30 = scalar_lea.vmem %s931_s4, 256 }
 0x145   : > { %p653_p10 = scmp.ne.s32.totalorder %s931_s4, %s652_s30  ;;  %s735_s22 = smov [#allocation7]  }
 0x146   : > { %s656_s26 = sshll.u32 %s735_s22, 4  ;;  %s657_s26 = int_to_ptr.vmem [resolvable:$false] %s656_s26 }
 0x147   : > { %p654_p13 = pnand %p653_p10, %p850_p12  ;;  %s658_s7 = scalar_lea.vmem %s657_s26, 512 }
 0x148   : > { %p659_p7 = scmp.lt.s32.totalorder %s931_s4, %s657_s26  ;;  %p660_p9 = scmp.lt.s32.totalorder %s658_s7, %s652_s30 }
 0x149   : > { %p655_p3 = pneg %p654_p13 }
 0x14a   : > { %p661_p1 = por %p660_p9, %p659_p7 }
 0x14c   : > { %p662_p0 = pnand %p661_p1, %p655_p3 }
 0x14e   : > { %665 = shalt.err (!%p662_p0)
}
 0x14f   : > { %s666_s8 = scalar_lea.hbm %s929_s28, 256  ;;  %s670_s23 = scalar_lea.hbm %s1011_s2, 512 }
 0x150   : > { %p667_p5 = scmp.ne.s32.totalorder %s929_s28, %s666_s8  ;;  %p671_p11 = scmp.lt.u32.totalorder %s929_s28, %s1011_s2 }
 0x151   : > { %p672_p6 = scmp.lt.u32.totalorder %s670_s23, %s666_s8  ;;  %p674_p10 = scmp.lt.u32.totalorder %s666_s8, %s929_s28 }
 0x152   : > { %p668_p2 = pnand %p667_p5, %p850_p12 }
 0x153   : > { %p673_p8 = por %p672_p6, %p671_p11 }
 0x154   : > { %p669_p4 = pneg %p668_p2 }
 0x155   : > { %p675_p13 = por %p674_p10, %p673_p8 }
 0x157   : > { %p676_p3 = pnand %p675_p13, %p669_p4 }
 0x159   : > { %679 = shalt.err (!%p676_p3)
}
 0x15a   : > { %506 = dma.vmem_to_hbm [thread:$0]  (%p850_p12), %s931_s4, 256, %s929_s28, %s309_s29, %s733_s16, %s733_s16, %s734_s27  }
 0x15b PF: > { %s358_s9 = sand.u32 1, %s714_s12   ;;  %p1027_p7 = scmp.ne.s32.totalorder %s1017_s19, 0 }
 0x15c   : > { %p1028_p9 = scmp.ge.s32.totalorder %s726_s15, 2  ;;  %s359_s25 = scalar_lea.sflag [#allocation4], %s358_s9 }
 0x15e   : > { %p519_p1 = pnand %p1028_p9, %p1027_p7 }
 0x160   : > { %705 = dma.done.wait (!%p519_p1), %s359_s25, 256  }
 0x161   : > { %707 = vsyncadd (!%p519_p1), %s359_s25, 4294967040  ;;  %s368_s21 = scalar_lea.sflag [#allocation9], %s358_s9 }
 0x162   : > { %709 = dma.done.wait (!%p519_p1), %s368_s21, 256  }
 0x163   : > { %711 = vsyncadd (!%p519_p1), %s368_s21, 4294967040  ;;  %p21_p12 = scmp.ge.s32.totalorder %s812_s24, 4   ;;  %s1029_s12 = smov %s718_s13 }
 0x164   : > { %s1030_s13 = smov %s722_s14  ;;  %s1031_s14 = smov %s846_s17 }
 0x165   : > { %s1032_s15 = smov %s812_s24  ;;  %23 = sbr.rel (!%p21_p12) target bundleno = 8 (0x8), region = 95 }
 0x16c   :  { %373 = vsyncpa [#allocation3], 1 }
 0x16d   :  { %375 = vsyncpa [#allocation3 + $0x1], 1 }
 0x16e   :  { %376 = vsyncpa [#allocation6], 1 }
 0x16f   :  { %378 = vsyncpa [#allocation6 + $0x1], 1 }
 0x170   :  { %379 = vsyncpa [#allocation4], 1 }
 0x171   :  { %381 = vsyncpa [#allocation4 + $0x1], 1 }
 0x172   :  { %382 = vsyncpa [#allocation9], 1 }
 0x173   :  { %384 = vsyncpa [#allocation9 + $0x1], 1 }

</bundles_post_ra>
